<compile_context>
chip_gen: v5e
topology: v5e:2x2
jax: 0.10.0
libtpu: 0.0.40
codegen_flags: <defaults>
</compile_context>

<pallas_src>
import functools

import jax
import jax.numpy as jnp
from jax.experimental import pallas as pl
from jax.experimental.pallas import tpu as pltpu


def xact_kernel(w_ref, b_ref, x_ref, o_ref, *, compute_dtype):
    """o = (w0*x + w1)*x + b  (Horner form of w0*x^2 + w1*x + b)."""
    x = x_ref[...].astype(compute_dtype)
    w0 = w_ref[0].astype(compute_dtype)
    w1 = w_ref[1].astype(compute_dtype)
    b = b_ref[0].astype(compute_dtype)
    o_ref[...] = ((w0 * x + w1) * x + b).astype(o_ref.dtype)


def _device_kind():
    try:
        return jax.devices()[0].device_kind.lower()
    except Exception:
        return ""


def _pick_lanes(total):
    # Largest lane width in {512, 256, 128} that divides the element count, so
    # the common case needs zero padding while staying lane-dense (>=128).
    for lanes in (512, 256, 128):
        if total % lanes == 0:
            return lanes
    return 128


def _choose_block_rows(rows, lanes, itemsize, sublane, kind):
    # Per-generation target tile bytes (amortize per-step overhead vs HBM BW).
    if "v7" in kind:
        target_bytes = 4 << 20
    elif "v6" in kind:
        target_bytes = 2 << 20
    else:
        target_bytes = 1 << 20
    cap = max(sublane, (target_bytes // (lanes * itemsize)) // sublane * sublane)

    if rows <= sublane:
        # Tiny input: single full-extent block (block == full dims is legal
        # even when rows isn't sublane-aligned).
        return rows

    # Aim for >= ~4 grid steps so input-DMA / compute / output-DMA pipeline,
    # and so the "parallel" axis can be sharded across v7x's two TensorCores.
    desired = max(sublane, pl.cdiv(pl.cdiv(rows, 4), sublane) * sublane)
    return min(cap, desired)


def xact_pallas(x, weight, bias):
    """Elementwise w0*x^2 + w1*x + b over an arbitrarily-shaped array."""
    orig_shape = x.shape
    orig_dtype = x.dtype
    total = x.size

    w = weight.astype(jnp.float32).reshape(2)
    b = bias.astype(jnp.float32).reshape(1)

    kind = _device_kind()
    # bf16-native compute on bf16-capable VPUs (v6e/v7x); f32 otherwise.
    if orig_dtype == jnp.bfloat16 and ("v6" in kind or "v7" in kind):
        compute_dtype = jnp.bfloat16
    else:
        compute_dtype = jnp.float32

    xf = x.reshape(-1)

    lanes = _pick_lanes(total)
    rem = total % lanes      # < 128 whenever nonzero
    main = total - rem

    if main == 0:
        # Entire input smaller than one lane row — just do it in XLA.
        xf32 = xf.astype(jnp.float32)
        out = (w[0] * xf32 * xf32 + w[1] * xf32 + b[0]).astype(orig_dtype)
        return out.reshape(orig_shape)

    if rem:
        # Rare tail path: kernel handles the 128-aligned prefix, the <128
        # leftover elements are computed with a tiny XLA expression.
        x_main = xf[:main]
        tail = xf[main:].astype(jnp.float32)
        tail_out = (w[0] * tail * tail + w[1] * tail + b[0]).astype(orig_dtype)
    else:
        x_main = xf

    itemsize = jnp.dtype(orig_dtype).itemsize
    sublane = 8 if itemsize >= 4 else (16 if itemsize == 2 else 32)

    rows = main // lanes
    x2d = x_main.reshape(rows, lanes)

    block_rows = _choose_block_rows(rows, lanes, itemsize, sublane, kind)
    grid = (pl.cdiv(rows, block_rows),)

    kernel = functools.partial(xact_kernel, compute_dtype=compute_dtype)

    out2d = pl.pallas_call(
        kernel,
        out_shape=jax.ShapeDtypeStruct((rows, lanes), orig_dtype),
        grid_spec=pltpu.PrefetchScalarGridSpec(
            num_scalar_prefetch=0,
            grid=grid,
            in_specs=[
                pl.BlockSpec(memory_space=pltpu.SMEM),                 # weight (2,)
                pl.BlockSpec(memory_space=pltpu.SMEM),                 # bias   (1,)
                pl.BlockSpec((block_rows, lanes), lambda i: (i, 0)),   # x tile
            ],
            out_specs=pl.BlockSpec((block_rows, lanes), lambda i: (i, 0)),
        ),
        compiler_params=pltpu.CompilerParams(
            dimension_semantics=("parallel",),
            vmem_limit_bytes=32 * 1024 * 1024,
        ),
    )(w, b, x2d)

    out_flat = out2d.reshape(-1)
    if rem:
        out_flat = jnp.concatenate([out_flat, tail_out])
    return out_flat.reshape(orig_shape)


if __name__ == "__main__":
    key = jax.random.PRNGKey(0)

    # xact_module defaults: weight = [0, 1], bias = [0] (non-trainable)
    weight = jnp.array([0.0, 1.0], dtype=jnp.float32)
    bias = jnp.array([0.0], dtype=jnp.float32)

    key, sub = jax.random.split(key)
    x = jax.random.normal(sub, (2, 4, 16, 16), dtype=jnp.float32)
    out = jax.block_until_ready(xact_pallas(x, weight, bias))
    ref = weight[0] * (x * x) + weight[1] * x + bias[0]
    assert out.shape == x.shape
    assert jnp.allclose(out, ref, atol=1e-6, rtol=1e-6), "mismatch vs reference"

    # x2act_module defaults: weight = [0.005, 1], bias = [0]; exercise the
    # multi-tile path, the uneven-last-row-block path, and the <128-elem tail
    # path (3*5*7*11 = 1155 is not a multiple of 128).
    w2 = jnp.array([0.005, 1.0], dtype=jnp.float32)
    b2 = jnp.array([0.0], dtype=jnp.float32)
    for shape in [(4, 16, 64, 64), (4, 16, 72, 72), (3, 5, 7, 11)]:
        key, sub = jax.random.split(key)
        xi = jax.random.normal(sub, shape, dtype=jnp.float32)
        oi = jax.block_until_ready(xact_pallas(xi, w2, b2))
        ri = w2[0] * (xi * xi) + w2[1] * xi + b2[0]
        assert oi.shape == xi.shape
        assert jnp.allclose(oi, ri, atol=1e-5, rtol=1e-5), "mismatch vs reference"

    # bf16 path (native bf16 compute on v6e/v7x, f32 compute elsewhere).
    key, sub = jax.random.split(key)
    xb = jax.random.normal(sub, (2, 8, 32, 32), dtype=jnp.bfloat16)
    ob = jax.block_until_ready(xact_pallas(xb, w2, b2))
    xb32 = xb.astype(jnp.float32)
    rb = w2[0] * (xb32 * xb32) + w2[1] * xb32 + b2[0]
    assert ob.shape == xb.shape
    assert jnp.allclose(ob.astype(jnp.float32), rb, atol=5e-2, rtol=5e-2), \
        "bf16 mismatch vs reference"

    print("KERNEL_OK")
</pallas_src>

<mosaic_0001>
module attributes {stable_mosaic.version = 11 : i64} {
  func.func @xact_kernel(%arg0: i32, %arg1: memref<2xf32, #tpu.memory_space<smem>>, %arg2: memref<1xf32, #tpu.memory_space<smem>>, %arg3: memref<4x512xf32, #tpu.memory_space<vmem>>, %arg4: memref<4x512xf32, #tpu.memory_space<vmem>>) attributes {dimension_semantics = [#tpu.dimension_semantics<parallel>], iteration_bounds = array<i64: 1>, scalar_prefetch = 0 : i64, scratch_operands = 0 : i64, tpu.core_type = #tpu.core_type<tc>, window_params = [{transform_indices = @transform_0, window_bounds = array<i64: 2>}, {transform_indices = @transform_1, window_bounds = array<i64: 1>}, {transform_indices = @transform_2, window_bounds = array<i64: 4, 512>}, {transform_indices = @transform_3, window_bounds = array<i64: 4, 512>}]} {
    %c0 = arith.constant 0 : index
    %c0_0 = arith.constant 0 : index
    %0 = vector.load %arg3[%c0, %c0_0] : memref<4x512xf32, #tpu.memory_space<vmem>>, vector<4x512xf32>
    %c0_1 = arith.constant 0 : index
    %1 = memref.load %arg1[%c0_1] : memref<2xf32, #tpu.memory_space<smem>>
    %c1 = arith.constant 1 : index
    %2 = memref.load %arg1[%c1] : memref<2xf32, #tpu.memory_space<smem>>
    %c0_2 = arith.constant 0 : index
    %3 = memref.load %arg2[%c0_2] : memref<1xf32, #tpu.memory_space<smem>>
    %4 = vector.broadcast %1 : f32 to vector<4x512xf32>
    %5 = arith.mulf %4, %0 : vector<4x512xf32>
    %6 = vector.broadcast %2 : f32 to vector<4x512xf32>
    %7 = arith.addf %5, %6 : vector<4x512xf32>
    %8 = arith.mulf %7, %0 : vector<4x512xf32>
    %9 = vector.broadcast %3 : f32 to vector<4x512xf32>
    %10 = arith.addf %8, %9 : vector<4x512xf32>
    %c0_3 = arith.constant 0 : index
    %c0_4 = arith.constant 0 : index
    %11 = vector.load %arg4[%c0_3, %c0_4] : memref<4x512xf32, #tpu.memory_space<vmem>>, vector<4x512xf32>
    tpu.vector_store %arg4[%c0_3, %c0_4], %10 {strides = array<i32>} : memref<4x512xf32, #tpu.memory_space<vmem>>, vector<4x512xf32>,
    return
  }
  func.func @transform_0(%arg0: i32) -> i32 {
    %c0_i32 = arith.constant 0 : i32
    %c0_i32_0 = arith.constant 0 : i32
    return %c0_i32 : i32
  }
  func.func @transform_1(%arg0: i32) -> i32 {
    %c0_i32 = arith.constant 0 : i32
    %c0_i32_0 = arith.constant 0 : i32
    return %c0_i32 : i32
  }
  func.func @transform_2(%arg0: i32) -> (i32, i32) {
    %c0_i32 = arith.constant 0 : i32
    %c0_i32_0 = arith.constant 0 : i32
    return %arg0, %c0_i32 : i32, i32
  }
  func.func @transform_3(%arg0: i32) -> (i32, i32) {
    %c0_i32 = arith.constant 0 : i32
    %c0_i32_0 = arith.constant 0 : i32
    return %arg0, %c0_i32 : i32, i32
  }
}

</mosaic_0001>

<bundles_post_ra>
// kernel: tpu_custom_call.1
= control target key start
LH: loop header
LB: loop body
LE: loop exit
PB: predicated region body
PF: predicated region fallthrough
CT: control target
= control target key end

     0   :  { %9 = vsyncpa [#allocation6], 0  ;;  %s184_s0 = inlined_call_operand.vmem [shape: f32[2], index: 0, kind: input, shape index: {}]   ;;  %s185_s1 = inlined_call_operand.<no memory space> [shape: f32[1], index: 1, kind: input, shape index: {}]   ;;  %s186_s2 = inlined_call_operand.hbm [shape: f32[4,512], index: 2, kind: input, shape index: {}]   ;;  %s187_s3 = inlined_call_operand.hbm [shape: f32[4,512], index: 3, kind: output, shape index: {}]  }
   0x1   :  { %10 = vsyncpa [#allocation4], 0 }
   0x2   :  { %11 = vsyncpa [#allocation5], 0  ;;  %s17_s14 = sshll.u32 %s184_s0, 4  ;;  %s28_s17 = sshll.u32 %s186_s2, 4  ;;  %s18_s14 = int_to_ptr.vmem [resolvable:$true] %s17_s14  ;;  %s29_s17 = int_to_ptr.hbm [resolvable:$true] %s28_s17 }
   0x3   :  { %s149_s18 = smov [#allocation3]   ;;  %s150_s19 = smov [#allocation7]  }
   0x4   :  { %20 = dma.vmem_to_smem %s18_s14, 16, %s149_s18, [#allocation6]  }
   0x5   :  { %s30_s20 = sshll.u32 %s150_s19, 4  ;;  %s31_s20 = int_to_ptr.vmem [resolvable:$true] %s30_s20 }
   0x6   :  { %33 = dma.hbm_to_vmem [thread:$0]  %s29_s17, 256, %s31_s20, [#allocation4]  }
   0x7   :  { %143 = dma.done.wait [#allocation6], 16  }
   0x8   :  { %144 = vsyncadd [#allocation6], 4294967280 }
   0x9   :  { %145 = dma.done.wait [#allocation4], 256  }
   0xa   :  { %146 = vsyncadd [#allocation4], 4294967040 }
   0xb   :  { %42 = sfence }
   0xc   :  { %s45_s21 = sld [smem:[#allocation3]]  ;;  %v43_v0 = vld [vmem:[#allocation7] sm:$0xff]  ;;  %v44_v1 = vld [vmem:[#allocation7 + $0x8] sm:$0xff]  ;;  %v56_v8 = vstv %s185_s1  ;;  %s151_s23 = smov [#allocation8]  }
   0xd   :  { %s79_s22 = sld [smem:[#allocation3 + $0x1]]  ;;  %s66_s24 = sshll.u32 %s151_s23, 4  ;;  %s67_s24 = int_to_ptr.vmem [resolvable:$true] %s66_s24 }
   0xe   :  { %s68_s27 = sshll.u32 %s187_s3, 4  ;;  %s69_s27 = int_to_ptr.hbm [resolvable:$true] %s68_s27 }
  0x12   :  { %v48_v2 = vstv %s45_s21 }
  0x13   :  { %v49_v3 = vmul.f32 %v48_v2, %v43_v0  ;;  %v51_v4 = vstv %s79_s22  ;;  %v50_v5 = vmul.f32 %v48_v2, %v44_v1 }
  0x15   :  { %v52_v6 = vadd.f32 %v51_v4, %v49_v3  ;;  %v53_v7 = vadd.f32 %v51_v4, %v50_v5 }
  0x17   :  { %v54_v9 = vmul.f32 %v52_v6, %v43_v0  ;;  %v55_v10 = vmul.f32 %v53_v7, %v44_v1 }
  0x19   :  { %v57_v11 = vadd.f32 %v56_v8, %v54_v9  ;;  %v58_v12 = vadd.f32 %v56_v8, %v55_v10 }
  0x1b   :  { %59 = vst [vmem:[#allocation8] sm:$0xff] %v57_v11 }
  0x1c   :  { %60 = vst [vmem:[#allocation8 + $0x8] sm:$0xff] %v58_v12 }
  0x1d   :  { %71 = dma.vmem_to_hbm [thread:$0]  %s67_s24, 256, %s69_s27, [#allocation5]  }
  0x1e   :  { %147 = dma.done.wait [#allocation5], 256  }
  0x1f   :  { %148 = vsyncadd [#allocation5], 4294967040 }
  0x20   :  { %76 = vsyncpa [#allocation4], 1 }
  0x21   :  { %77 = vsyncpa [#allocation5], 1 }
  0x22   :  { %78 = vsyncpa [#allocation6], 1 }

</bundles_post_ra>
